<compile_context>
chip_gen: v7x
topology: tpu7x:2x2x1
jax: 0.10.0
libtpu: 0.0.40
codegen_flags: <defaults>
</compile_context>

<pallas_src>
import jax
import jax.numpy as jnp
from jax.experimental import pallas as pl
from jax.experimental.pallas import tpu as pltpu


def _twist2mat_kernel(t_ref, o_ref):
    # t_ref: (3, TILE_R, 128)  -> component k as a full (TILE_R, 128) slab
    # o_ref: (9, TILE_R, 128)  -> row-major rotation-matrix entries
    w0 = t_ref[0]
    w1 = t_ref[1]
    w2 = t_ref[2]

    n2 = w0 * w0 + w1 * w1 + w2 * w2
    theta = jnp.maximum(jnp.sqrt(n2), 1e-5)          # norm clamped at 1e-5
    inv = 1.0 / theta
    a0 = w0 * inv
    a1 = w1 * inv
    a2 = w2 * inv

    s = jnp.sin(theta)                               # EUP
    c1 = 1.0 - jnp.cos(theta)                        # EUP

    sq0 = a0 * a0
    sq1 = a1 * a1
    sq2 = a2 * a2

    # shared products for the symmetric off-diagonal pairs
    caa01 = c1 * (a0 * a1)
    caa02 = c1 * (a0 * a2)
    caa12 = c1 * (a1 * a2)
    sa0 = s * a0
    sa1 = s * a1
    sa2 = s * a2

    # R = I + sin(theta)*A + (1-cos(theta))*A@A, row-major entries
    o_ref[0] = 1.0 - c1 * (sq1 + sq2)
    o_ref[1] = caa01 - sa2
    o_ref[2] = caa02 + sa1
    o_ref[3] = caa01 + sa2
    o_ref[4] = 1.0 - c1 * (sq0 + sq2)
    o_ref[5] = caa12 - sa0
    o_ref[6] = caa02 - sa1
    o_ref[7] = caa12 + sa0
    o_ref[8] = 1.0 - c1 * (sq0 + sq1)


def twist2mat_forward(twist_batch, *, max_tile_rows=512):
    """Equivalent of Twist2Mat.forward: (B, 3) twists -> (B, 3, 3) rotations."""
    B, three = twist_batch.shape
    assert three == 3

    # --- tiling: batch -> (ROWS, 128) slabs, ROWS a multiple of 8 -----------
    rows = max(8, pl.cdiv(B, 128))
    rows = pl.cdiv(rows, 8) * 8                      # multiple of 8 sublanes

    steps = max(1, pl.cdiv(rows, max_tile_rows))
    if rows > 8 and steps == 1:
        steps = 2                                    # keep both v7x TCs busy
    tile_r = pl.cdiv(pl.cdiv(rows, steps), 8) * 8    # rows per grid step
    rows_pad = steps * tile_r
    lanes_pad = rows_pad * 128

    # --- pack input: (B, 3) -> (3, rows_pad, 128), zero-padded --------------
    # padded (zero) twists hit the 1e-5 clamp -> axis = 0, R = I, discarded
    t = twist_batch.astype(jnp.float32).T            # (3, B)
    t = jnp.pad(t, ((0, 0), (0, lanes_pad - B)))     # (3, lanes_pad)
    t = t.reshape(3, rows_pad, 128)

    out = pl.pallas_call(
        _twist2mat_kernel,
        out_shape=jax.ShapeDtypeStruct((9, rows_pad, 128), jnp.float32),
        grid_spec=pltpu.PrefetchScalarGridSpec(
            num_scalar_prefetch=0,
            grid=(steps,),
            in_specs=[pl.BlockSpec((3, tile_r, 128), lambda i: (0, i, 0))],
            out_specs=pl.BlockSpec((9, tile_r, 128), lambda i: (0, i, 0)),
        ),
        compiler_params=pltpu.CompilerParams(
            dimension_semantics=("parallel",)),
    )(t)

    # (9, rows_pad, 128) -> (9, B) -> (B, 3, 3); tiny glue outside the kernel
    r9 = out.reshape(9, lanes_pad)[:, :B]
    return r9.T.reshape(B, 3, 3)


def _twist2mat_ref(twist_batch):
    """Pure-JAX transcription of the PyTorch module (reference)."""
    B = twist_batch.shape[0]
    theta = jnp.maximum(
        jnp.linalg.norm(twist_batch, axis=1, keepdims=True), 1e-5)   # (B,1)
    axis = twist_batch / theta
    o = jnp.zeros((B, 1), twist_batch.dtype)
    a0, a1, a2 = axis[:, 0:1], axis[:, 1:2], axis[:, 2:3]
    A = jnp.concatenate(
        (o, -a2, a1, a2, o, -a0, -a1, a0, o), axis=1).reshape(B, 3, 3)
    s = jnp.sin(theta).reshape(B, 1, 1)
    c = (1.0 - jnp.cos(theta)).reshape(B, 1, 1)
    I = jnp.eye(3, dtype=twist_batch.dtype)[None]
    return I + A * s + jnp.matmul(A, A) * c


if __name__ == "__main__":
    B = 8
    key = jax.random.PRNGKey(0)
    twist = jax.random.normal(key, (B, 3), dtype=jnp.float32)
    # exercise the small-angle clamp path too
    twist = twist.at[0].set(jnp.zeros((3,), jnp.float32))

    R = twist2mat_forward(twist)
    R = jax.block_until_ready(R)

    R_ref = _twist2mat_ref(twist)
    assert R.shape == (B, 3, 3)
    assert jnp.allclose(R, R_ref, atol=1e-5, rtol=1e-5)

    # quick check on a larger, multi-step batch (covers the tiling path)
    B2 = 3000
    twist2 = jax.random.normal(jax.random.PRNGKey(1), (B2, 3), jnp.float32)
    R2 = jax.block_until_ready(twist2mat_forward(twist2))
    assert jnp.allclose(R2, _twist2mat_ref(twist2), atol=1e-5, rtol=1e-5)

    print("KERNEL_OK")
</pallas_src>

<mosaic_0001>
module attributes {stable_mosaic.version = 11 : i64} {
  func.func @_twist2mat_kernel(%arg0: i32, %arg1: memref<3x8x128xf32, #tpu.memory_space<vmem>>, %arg2: memref<9x8x128xf32, #tpu.memory_space<vmem>>) attributes {dimension_semantics = [#tpu.dimension_semantics<parallel>], iteration_bounds = array<i64: 1>, scalar_prefetch = 0 : i64, scratch_operands = 0 : i64, tpu.core_type = #tpu.core_type<tc>, window_params = [{transform_indices = @transform_0, window_bounds = array<i64: 3, 8, 128>}, {transform_indices = @transform_1, window_bounds = array<i64: 9, 8, 128>}]} {
    %c0 = arith.constant 0 : index
    %c0_0 = arith.constant 0 : index
    %c0_1 = arith.constant 0 : index
    %0 = vector.load %arg1[%c0, %c0_0, %c0_1] : memref<3x8x128xf32, #tpu.memory_space<vmem>>, vector<1x8x128xf32>
    %1 = vector.shape_cast %0 : vector<1x8x128xf32> to vector<8x128xf32>
    %c1 = arith.constant 1 : index
    %c0_2 = arith.constant 0 : index
    %c0_3 = arith.constant 0 : index
    %2 = vector.load %arg1[%c1, %c0_2, %c0_3] : memref<3x8x128xf32, #tpu.memory_space<vmem>>, vector<1x8x128xf32>
    %3 = vector.shape_cast %2 : vector<1x8x128xf32> to vector<8x128xf32>
    %c2 = arith.constant 2 : index
    %c0_4 = arith.constant 0 : index
    %c0_5 = arith.constant 0 : index
    %4 = vector.load %arg1[%c2, %c0_4, %c0_5] : memref<3x8x128xf32, #tpu.memory_space<vmem>>, vector<1x8x128xf32>
    %5 = vector.shape_cast %4 : vector<1x8x128xf32> to vector<8x128xf32>
    %6 = arith.mulf %1, %1 : vector<8x128xf32>
    %7 = arith.mulf %3, %3 : vector<8x128xf32>
    %8 = arith.addf %6, %7 : vector<8x128xf32>
    %9 = arith.mulf %5, %5 : vector<8x128xf32>
    %10 = arith.addf %8, %9 : vector<8x128xf32>
    %11 = math.sqrt %10 : vector<8x128xf32>
    %cst = arith.constant 9.99999974E-6 : f32
    %12 = vector.broadcast %cst : f32 to vector<8x128xf32>
    %13 = arith.maximumf %11, %12 : vector<8x128xf32>
    %cst_6 = arith.constant 1.000000e+00 : f32
    %14 = vector.broadcast %cst_6 : f32 to vector<8x128xf32>
    %15 = arith.divf %14, %13 : vector<8x128xf32>
    %16 = arith.mulf %1, %15 : vector<8x128xf32>
    %17 = arith.mulf %3, %15 : vector<8x128xf32>
    %18 = arith.mulf %5, %15 : vector<8x128xf32>
    %19 = math.sin %13 : vector<8x128xf32>
    %20 = math.cos %13 : vector<8x128xf32>
    %cst_7 = arith.constant 1.000000e+00 : f32
    %21 = vector.broadcast %cst_7 : f32 to vector<8x128xf32>
    %22 = arith.subf %21, %20 : vector<8x128xf32>
    %23 = arith.mulf %16, %16 : vector<8x128xf32>
    %24 = arith.mulf %17, %17 : vector<8x128xf32>
    %25 = arith.mulf %18, %18 : vector<8x128xf32>
    %26 = arith.mulf %16, %17 : vector<8x128xf32>
    %27 = arith.mulf %22, %26 : vector<8x128xf32>
    %28 = arith.mulf %16, %18 : vector<8x128xf32>
    %29 = arith.mulf %22, %28 : vector<8x128xf32>
    %30 = arith.mulf %17, %18 : vector<8x128xf32>
    %31 = arith.mulf %22, %30 : vector<8x128xf32>
    %32 = arith.mulf %19, %16 : vector<8x128xf32>
    %33 = arith.mulf %19, %17 : vector<8x128xf32>
    %34 = arith.mulf %19, %18 : vector<8x128xf32>
    %35 = arith.addf %24, %25 : vector<8x128xf32>
    %36 = arith.mulf %22, %35 : vector<8x128xf32>
    %cst_8 = arith.constant 1.000000e+00 : f32
    %37 = vector.broadcast %cst_8 : f32 to vector<8x128xf32>
    %38 = arith.subf %37, %36 : vector<8x128xf32>
    %c0_9 = arith.constant 0 : index
    %c0_10 = arith.constant 0 : index
    %c0_11 = arith.constant 0 : index
    %39 = vector.load %arg2[%c0_9, %c0_10, %c0_11] : memref<9x8x128xf32, #tpu.memory_space<vmem>>, vector<1x8x128xf32>
    %40 = vector.shape_cast %39 : vector<1x8x128xf32> to vector<8x128xf32>
    %41 = vector.shape_cast %38 : vector<8x128xf32> to vector<1x8x128xf32>
    tpu.vector_store %arg2[%c0_9, %c0_10, %c0_11], %41 {strides = array<i32>} : memref<9x8x128xf32, #tpu.memory_space<vmem>>, vector<1x8x128xf32>,
    %42 = arith.subf %27, %34 : vector<8x128xf32>
    %c1_12 = arith.constant 1 : index
    %c0_13 = arith.constant 0 : index
    %c0_14 = arith.constant 0 : index
    %43 = vector.load %arg2[%c1_12, %c0_13, %c0_14] : memref<9x8x128xf32, #tpu.memory_space<vmem>>, vector<1x8x128xf32>
    %44 = vector.shape_cast %43 : vector<1x8x128xf32> to vector<8x128xf32>
    %45 = vector.shape_cast %42 : vector<8x128xf32> to vector<1x8x128xf32>
    tpu.vector_store %arg2[%c1_12, %c0_13, %c0_14], %45 {strides = array<i32>} : memref<9x8x128xf32, #tpu.memory_space<vmem>>, vector<1x8x128xf32>,
    %46 = arith.addf %29, %33 : vector<8x128xf32>
    %c2_15 = arith.constant 2 : index
    %c0_16 = arith.constant 0 : index
    %c0_17 = arith.constant 0 : index
    %47 = vector.load %arg2[%c2_15, %c0_16, %c0_17] : memref<9x8x128xf32, #tpu.memory_space<vmem>>, vector<1x8x128xf32>
    %48 = vector.shape_cast %47 : vector<1x8x128xf32> to vector<8x128xf32>
    %49 = vector.shape_cast %46 : vector<8x128xf32> to vector<1x8x128xf32>
    tpu.vector_store %arg2[%c2_15, %c0_16, %c0_17], %49 {strides = array<i32>} : memref<9x8x128xf32, #tpu.memory_space<vmem>>, vector<1x8x128xf32>,
    %50 = arith.addf %27, %34 : vector<8x128xf32>
    %c3 = arith.constant 3 : index
    %c0_18 = arith.constant 0 : index
    %c0_19 = arith.constant 0 : index
    %51 = vector.load %arg2[%c3, %c0_18, %c0_19] : memref<9x8x128xf32, #tpu.memory_space<vmem>>, vector<1x8x128xf32>
    %52 = vector.shape_cast %51 : vector<1x8x128xf32> to vector<8x128xf32>
    %53 = vector.shape_cast %50 : vector<8x128xf32> to vector<1x8x128xf32>
    tpu.vector_store %arg2[%c3, %c0_18, %c0_19], %53 {strides = array<i32>} : memref<9x8x128xf32, #tpu.memory_space<vmem>>, vector<1x8x128xf32>,
    %54 = arith.addf %23, %25 : vector<8x128xf32>
    %55 = arith.mulf %22, %54 : vector<8x128xf32>
    %cst_20 = arith.constant 1.000000e+00 : f32
    %56 = vector.broadcast %cst_20 : f32 to vector<8x128xf32>
    %57 = arith.subf %56, %55 : vector<8x128xf32>
    %c4 = arith.constant 4 : index
    %c0_21 = arith.constant 0 : index
    %c0_22 = arith.constant 0 : index
    %58 = vector.load %arg2[%c4, %c0_21, %c0_22] : memref<9x8x128xf32, #tpu.memory_space<vmem>>, vector<1x8x128xf32>
    %59 = vector.shape_cast %58 : vector<1x8x128xf32> to vector<8x128xf32>
    %60 = vector.shape_cast %57 : vector<8x128xf32> to vector<1x8x128xf32>
    tpu.vector_store %arg2[%c4, %c0_21, %c0_22], %60 {strides = array<i32>} : memref<9x8x128xf32, #tpu.memory_space<vmem>>, vector<1x8x128xf32>,
    %61 = arith.subf %31, %32 : vector<8x128xf32>
    %c5 = arith.constant 5 : index
    %c0_23 = arith.constant 0 : index
    %c0_24 = arith.constant 0 : index
    %62 = vector.load %arg2[%c5, %c0_23, %c0_24] : memref<9x8x128xf32, #tpu.memory_space<vmem>>, vector<1x8x128xf32>
    %63 = vector.shape_cast %62 : vector<1x8x128xf32> to vector<8x128xf32>
    %64 = vector.shape_cast %61 : vector<8x128xf32> to vector<1x8x128xf32>
    tpu.vector_store %arg2[%c5, %c0_23, %c0_24], %64 {strides = array<i32>} : memref<9x8x128xf32, #tpu.memory_space<vmem>>, vector<1x8x128xf32>,
    %65 = arith.subf %29, %33 : vector<8x128xf32>
    %c6 = arith.constant 6 : index
    %c0_25 = arith.constant 0 : index
    %c0_26 = arith.constant 0 : index
    %66 = vector.load %arg2[%c6, %c0_25, %c0_26] : memref<9x8x128xf32, #tpu.memory_space<vmem>>, vector<1x8x128xf32>
    %67 = vector.shape_cast %66 : vector<1x8x128xf32> to vector<8x128xf32>
    %68 = vector.shape_cast %65 : vector<8x128xf32> to vector<1x8x128xf32>
    tpu.vector_store %arg2[%c6, %c0_25, %c0_26], %68 {strides = array<i32>} : memref<9x8x128xf32, #tpu.memory_space<vmem>>, vector<1x8x128xf32>,
    %69 = arith.addf %31, %32 : vector<8x128xf32>
    %c7 = arith.constant 7 : index
    %c0_27 = arith.constant 0 : index
    %c0_28 = arith.constant 0 : index
    %70 = vector.load %arg2[%c7, %c0_27, %c0_28] : memref<9x8x128xf32, #tpu.memory_space<vmem>>, vector<1x8x128xf32>
    %71 = vector.shape_cast %70 : vector<1x8x128xf32> to vector<8x128xf32>
    %72 = vector.shape_cast %69 : vector<8x128xf32> to vector<1x8x128xf32>
    tpu.vector_store %arg2[%c7, %c0_27, %c0_28], %72 {strides = array<i32>} : memref<9x8x128xf32, #tpu.memory_space<vmem>>, vector<1x8x128xf32>,
    %73 = arith.addf %23, %24 : vector<8x128xf32>
    %74 = arith.mulf %22, %73 : vector<8x128xf32>
    %cst_29 = arith.constant 1.000000e+00 : f32
    %75 = vector.broadcast %cst_29 : f32 to vector<8x128xf32>
    %76 = arith.subf %75, %74 : vector<8x128xf32>
    %c8 = arith.constant 8 : index
    %c0_30 = arith.constant 0 : index
    %c0_31 = arith.constant 0 : index
    %77 = vector.load %arg2[%c8, %c0_30, %c0_31] : memref<9x8x128xf32, #tpu.memory_space<vmem>>, vector<1x8x128xf32>
    %78 = vector.shape_cast %77 : vector<1x8x128xf32> to vector<8x128xf32>
    %79 = vector.shape_cast %76 : vector<8x128xf32> to vector<1x8x128xf32>
    tpu.vector_store %arg2[%c8, %c0_30, %c0_31], %79 {strides = array<i32>} : memref<9x8x128xf32, #tpu.memory_space<vmem>>, vector<1x8x128xf32>,
    return
  }
  func.func @transform_0(%arg0: i32) -> (i32, i32, i32) {
    %c0_i32 = arith.constant 0 : i32
    %c0_i32_0 = arith.constant 0 : i32
    %c0_i32_1 = arith.constant 0 : i32
    return %c0_i32, %arg0, %c0_i32_0 : i32, i32, i32
  }
  func.func @transform_1(%arg0: i32) -> (i32, i32, i32) {
    %c0_i32 = arith.constant 0 : i32
    %c0_i32_0 = arith.constant 0 : i32
    %c0_i32_1 = arith.constant 0 : i32
    return %c0_i32, %arg0, %c0_i32_0 : i32, i32, i32
  }
}

</mosaic_0001>

<bundles_post_ra>
// kernel: tpu_custom_call.1
= control target key start
LH: loop header
LB: loop body
LE: loop exit
PB: predicated region body
PF: predicated region fallthrough
CT: control target
= control target key end

     0   :  { %6 = vsyncpa [#allocation3], 0  ;;  %s513_s0 = inlined_call_operand.hbm [shape: f32[3,8,128], index: 0, kind: input, shape index: {}]   ;;  %s514_s1 = inlined_call_operand.hbm [shape: f32[9,8,128], index: 1, kind: output, shape index: {}]  }
   0x1   :  { %7 = vsyncpa [#allocation4], 0  ;;  %s393_s6 = smov [#allocation2]   ;;  %s345_s10 = scalar_lea.hbm %s513_s0, 384 }
   0x2   :  { %s13_s7 = sshll.u32 %s393_s6, 4  ;;  %p346_p0 = scmp.ne.s32.totalorder %s513_s0, %s345_s10  ;;  %s14_s7 = int_to_ptr.vmem [resolvable:$true] %s13_s7 }
   0x3   :  { %p349_p1 = scmp.lt.u32.totalorder %s345_s10, %s513_s0 }
   0x5   :  { %p351_p2 = pnand %p349_p1, %p346_p0 }
   0x7   :  { %354 = shalt.err (!%p351_p2)
}
   0x8   :  { %s355_s15 = scalar_lea.vmem %s14_s7, 384  ;;  %p360_p4 = scmp.lt.s32.totalorder %s14_s7, %s14_s7 }
   0x9   :  { %p356_p3 = scmp.ne.s32.totalorder %s14_s7, %s355_s15  ;;  %p361_p5 = scmp.lt.s32.totalorder %s355_s15, %s355_s15 }
   0xb   :  { %p362_p6 = por %p361_p5, %p360_p4 }
   0xd   :  { %p363_p7 = pnand %p362_p6, %p356_p3 }
   0xf   :  { %366 = shalt.err (!%p363_p7)
}
  0x10   :  { %s394_s16 = smov 128   ;;  %s395_s17 = smov 8  }
  0x11   :  { %19 = dma.hbm_to_vmem [thread:$0]  %s513_s0, 384, %s14_s7, [#allocation3], %s394_s16, %s394_s16, %s395_s17  }
  0x12   :  { %389 = dma.done.wait [#allocation3], 384  }
  0x13   :  { %390 = vsyncadd [#allocation3], 4294966912  ;;  %v23_v0 = vld [vmem:[#allocation2] sm:$0xff]  ;;  %v25_v1 = vld [vmem:[#allocation2 + $0x8] sm:$0xff]  ;;  %v396_v30 = vmov 683565275  }
  0x14   :  { %v27_v2 = vld [vmem:[#allocation2 + $0x10] sm:$0xff]  ;;  %v28_v3 = vmul.f32 %v23_v0, %v23_v0  ;;  %v29_v4 = vmul.f32 %v25_v1, %v25_v1  ;;  %v397_v32 = vmov 2475754826   ;;  %v398_v34 = vmov 2131351028   ;;  %s402_s0 = smov [#allocation5]  }
  0x15   :  { %v31_v5 = vmul.f32 %v27_v2, %v27_v2  ;;  %v399_v36 = vmov 2102212464   ;;  %v400_v38 = vmov 920167782   ;;  %v401_v45 = vmov 1326507024  }
  0x16   :  { %v30_v6 = vadd.f32 %v29_v4, %v28_v3  ;;  %s303_s20 = sshll.u32 %s402_s0, 4  ;;  %s304_s20 = int_to_ptr.vmem [resolvable:$true] %s303_s20 }
  0x17   :  { %s367_s21 = scalar_lea.vmem %s304_s20, 1152  ;;  %p372_p9 = scmp.lt.s32.totalorder %s304_s20, %s304_s20 }
  0x18   :  { %v32_v7 = vadd.f32 %v31_v5, %v30_v6  ;;  %p368_p8 = scmp.ne.s32.totalorder %s304_s20, %s367_s21  ;;  %p373_p10 = scmp.lt.s32.totalorder %s367_s21, %s367_s21 }
  0x1a   :  { %337 = vrsqrt.f32 %v32_v7  ;;  %vm35_vm0 = vcmp.eq.f32.partialorder %v32_v7, inf  ;;  %v38_v9 = vand.u32 2147483648, %v32_v7  ;;  %vm37_vm1 = vcmp.eq.f32.partialorder %v32_v7, 0.0  ;;  %p374_p11 = por %p373_p10, %p372_p9 }
  0x1c   :  { %p375_p12 = pnand %p374_p11, %p368_p8 }
  0x24   :  { %v338_v8 = vpop.eup %337 }
  0x25   :  { %v34_v10 = vmul.f32 %v338_v8, %v32_v7 }
  0x27   :  { %v36_v11 = vsel %vm35_vm0, %v32_v7, %v34_v10 }
  0x28   :  { %v39_v12 = vsel %vm37_vm1, %v38_v9, %v36_v11 }
  0x29   :  { %v428_v13 = vmax.f32 %v39_v12, 1e-05 }
  0x2b   :  { %339 = vrcp.f32 %v428_v13  ;;  %v46_v14 = vand.u32 2147483647, %v428_v13  ;;  %v49_v15 = vand.u32 2139095040, %v428_v13  ;;  %vm48_vm9 = vcmp.lt.s32.totalorder %v428_v13, 0 }
  0x2c   :  { %vm138_vm1 = vweird.f32 %v428_v13 }
  0x2d   :  { %v50_v16 = vshrl.u32 %v49_v15, 23  ;;  %v53_v17 = vand.u32 8388607, %v46_v14  ;;  %vm47_vm10 = vcmp.le.f32.partialorder %v46_v14, 0.7853982 }
  0x2f   :  { %v315_v18 = vadd.s32 4294967169, %v50_v16  ;;  %v54_v20 = vor.u32 8388608, %v53_v17 }
  0x31   :  { %v56_v19 = vadd.s32 1, %v315_v18  ;;  %v94_v27 = vshll.u32 %v54_v20, 8 }
  0x33   :  { %vm57_vm2 = vcmp.gt.s32.totalorder %v56_v19, 0 }
  0x34   :  { %v58_v21 = vsel %vm57_vm2, %v56_v19, 0 }
  0x35   :  { %v340_v22 = vpop.eup %339  ;;  %v59_v23 = vshrl.u32 %v58_v21, 5  ;;  %v60_v24 = vand.u32 31, %v58_v21 }
  0x36   :  { %v435_v25 = vmul.f32 %v340_v22, %v25_v1  ;;  %v437_v26 = vmul.f32 %v340_v22, %v27_v2  ;;  %v439_v28 = vmul.f32 %v340_v22, %v23_v0 }
  0x37   :  { %v61_v29 = vsub.s32 32, %v60_v24  ;;  %v63_v31 = vshll.u32 %v396_v30, %v60_v24  ;;  %v66_v33 = vshll.u32 %v397_v32, %v60_v24  ;;  %v69_v35 = vshll.u32 %v398_v34, %v60_v24 }
  0x38   :  { %v72_v37 = vshll.u32 %v399_v36, %v60_v24  ;;  %v75_v39 = vshll.u32 %v400_v38, %v60_v24  ;;  %vm78_vm3 = vcmp.lt.s32.totalorder %v59_v23, 1  ;;  %vm79_vm4 = vcmp.lt.s32.totalorder %v59_v23, 2 }
  0x39   :  { %v62_v40 = vshrl.u32 %v396_v30, %v61_v29  ;;  %v64_v41 = vshrl.u32 %v397_v32, %v61_v29  ;;  %v67_v42 = vshrl.u32 %v398_v34, %v61_v29  ;;  %v70_v43 = vshrl.u32 %v399_v36, %v61_v29 }
  0x3a   :  { %v73_v44 = vshrl.u32 %v400_v38, %v61_v29  ;;  %v76_v46 = vshrl.u32 %v401_v45, %v61_v29  ;;  %vm80_vm5 = vcmp.lt.s32.totalorder %v59_v23, 3  ;;  %vm81_vm6 = vcmp.lt.s32.totalorder %v59_v23, 4 }
  0x3b   :  { %v65_v47 = vor.u32 %v64_v41, %v63_v31  ;;  %v68_v48 = vor.u32 %v67_v42, %v66_v33  ;;  %v71_v49 = vor.u32 %v70_v43, %v69_v35  ;;  %v255_v50 = vmul.f32 %v435_v25, %v435_v25 }
  0x3c   :  { %v74_v51 = vor.u32 %v73_v44, %v72_v37  ;;  %v77_v52 = vor.u32 %v76_v46, %v75_v39  ;;  %v256_v53 = vmul.f32 %v437_v26, %v437_v26  ;;  %v447_v54 = vmul.f32 %v435_v25, %v439_v28 }
  0x3d   :  { %v82_v55 = vsel %vm78_vm3, %v62_v40, %v65_v47  ;;  %v83_v56 = vsel %vm81_vm6, %v71_v49, 2102212464  ;;  %v86_v57 = vsel %vm78_vm3, %v65_v47, %v68_v48  ;;  %v90_v58 = vsel %vm78_vm3, %v68_v48, %v71_v49 }
  0x3e   :  { %v84_v59 = vsel %vm80_vm5, %v68_v48, %v83_v56  ;;  %v87_v60 = vsel %vm81_vm6, %v74_v51, 920167782  ;;  %v91_v61 = vsel %vm81_vm6, %v77_v52, 1326507024  ;;  %v453_v62 = vadd.f32 %v256_v53, %v255_v50 }
  0x3f   :  { %v88_v63 = vsel %vm80_vm5, %v71_v49, %v87_v60  ;;  %v92_v0 = vsel %vm80_vm5, %v74_v51, %v91_v61  ;;  %v459_v1 = vmul.f32 %v437_v26, %v439_v28  ;;  %v85_v2 = vsel %vm79_vm4, %v82_v55, %v84_v59 }
  0x40   :  { %v89_v3 = vsel %vm79_vm4, %v86_v57, %v88_v63  ;;  %v93_v4 = vsel %vm79_vm4, %v90_v58, %v92_v0  ;;  %v254_v5 = vmul.f32 %v439_v28, %v439_v28  ;;  %v476_v11 = vmul.f32 %v437_v26, %v435_v25 }
  0x41   :  { %v466_v6 = vmul.u32.u64.low %v94_v27, %v93_v4  ;;  %v467_v7 = vmul.u32.u64.high %v94_v27, %v93_v4, %v466_v6  ;;  %v469_v8 = vmul.u32.u64.low %v94_v27, %v89_v3  ;;  %v470_v9 = vmul.u32.u64.high %v94_v27, %v89_v3, %v469_v8 }
  0x42   :  { %v472_v10 = vadd.f32 %v256_v53, %v254_v5  ;;  %v478_v12 = vadd.f32 %v255_v50, %v254_v5  ;;  %v101_v15 = vmul.u32 %v94_v27, %v85_v2 }
  0x43   :  { %vm103_vm7 = vc.u32 %v467_v7, %v469_v8  ;;  %v104_v16 = vadd.s32 1, %v470_v9  ;;  %v102_v31 = vadd.s32 %v469_v8, %v467_v7 }
  0x45   :  { %v105_v17 = vsel %vm103_vm7, %v104_v16, %v470_v9 }
  0x46   :  { %v106_v18 = vadd.s32 %v105_v17, %v101_v15 }
  0x48   :  { %v107_v19 = vadd.s32 536870912, %v106_v18 }
  0x4a   :  { %v108_v20 = vshrl.u32 %v107_v19, 30 }
  0x4c   :  { %v109_v21 = vshll.u32 %v108_v20, 30  ;;  %v132_v42 = vsub.s32 4, %v108_v20 }
  0x4e   :  { %v110_v22 = vsub.s32 %v106_v18, %v109_v21  ;;  %v133_v45 = vsel %vm48_vm9, %v132_v42, %v108_v20 }
  0x4f   :  { %v135_v48 = vsel %vm47_vm10, 0, %v133_v45 }
  0x50   :  { %v112_v23 = vsub.s32 0, %v110_v22  ;;  %v139_v49 = vadd.s32 3, %v135_v48  ;;  %v243_v50 = vand.u32 3, %v135_v48 }
  0x52   :  { %v316_v24 = vmin.u32 %v112_v23, %v110_v22  ;;  %v140_v51 = vand.u32 3, %v139_v49  ;;  %vm248_vm11 = vcmp.eq.s32.totalorder %v243_v50, 2  ;;  %vm245_vm13 = vcmp.eq.s32.totalorder %v243_v50, 0 }
  0x53   :  { %vm244_vm15 = vcmp.lt.s32.totalorder %v243_v50, 2 }
  0x54   :  { %v114_v29 = vclz %v316_v24  ;;  %vm145_vm12 = vcmp.eq.s32.totalorder %v140_v51, 2  ;;  %vm142_vm14 = vcmp.eq.s32.totalorder %v140_v51, 0  ;;  %vm141_vm0 = vcmp.lt.s32.totalorder %v140_v51, 2 }
  0x56   :  { %v317_v30 = vadd.s32 4294967294, %v114_v29 }
  0x58   :  { %vm318_vm8 = vcmp.lt.s32.totalorder %v317_v30, 0 }
  0x59   :  { %v117_v32 = vsel %vm318_vm8, 0, %v317_v30 }
  0x5a   :  { %v118_v27 = vsub.s32 32, %v117_v32  ;;  %v119_v33 = vshll.u32 %v110_v22, %v117_v32  ;;  %v122_v34 = vsub.s32 4294967266, %v117_v32 }
  0x5c   :  { %v120_v35 = vshrl.u32 %v102_v31, %v118_v27  ;;  %v123_v36 = vadd.s32 127, %v122_v34 }
  0x5e   :  { %v121_v37 = vor.u32 %v120_v35, %v119_v33  ;;  %v124_v38 = vshll.u32 %v123_v36, 23 }
  0x60   :  { %v125_v39 = vor.u32 4788187, %v124_v38  ;;  %v128_v40 = vcvt.s32.f32 %v121_v37 }
  0x62   :  { %v126_v41 = vand.u32 2147483647, %v125_v39 }
  0x64   :  { %v129_v43 = vmul.f32 %v128_v40, %v126_v41 }
  0x66   :  { %v130_v44 = vxor.u32 2147483648, %v129_v43 }
  0x68   :  { %v131_v46 = vsel %vm48_vm9, %v130_v44, %v129_v43 }
  0x69   :  { %v134_v47 = vsel %vm47_vm10, %v428_v13, %v131_v46 }
  0x6a   :  { %341 = vcosq.f32 %v134_v47 }
  0x6b   :  { %343 = vsinq.f32 %v134_v47 }
  0x74   :  { %v342_v52 = vpop.eup %341 }
  0x75   :  { %v344_v53 = vpop.eup %343  ;;  %v146_v55 = vxor.u32 2147483648, %v342_v52 }
  0x76   :  { %v143_v56 = vxor.u32 2147483648, %v344_v53 }
  0x77   :  { %v250_v14 = vsel %vm248_vm11, %v146_v55, %v344_v53  ;;  %v147_v57 = vsel %vm145_vm12, %v146_v55, %v344_v53 }
  0x78   :  { %v247_v58 = vsel %vm245_vm13, %v342_v52, %v143_v56  ;;  %v144_v59 = vsel %vm142_vm14, %v342_v52, %v143_v56 }
  0x79   :  { %v251_v60 = vsel %vm244_vm15, %v247_v58, %v250_v14  ;;  %v148_v61 = vsel %vm141_vm0, %v144_v59, %v147_v57 }
  0x7a   :  { %v252_v63 = vsel %vm138_vm1, nan, %v251_v60  ;;  %v149_v0 = vsel %vm138_vm1, nan, %v148_v61 }
  0x7b   :  { %v253_v2 = vsub.f32 1.0, %v252_v63  ;;  %v265_v3 = vmul.f32 %v149_v0, %v437_v26  ;;  %v264_v4 = vmul.f32 %v149_v0, %v435_v25  ;;  %v263_v5 = vmul.f32 %v149_v0, %v439_v28 }
  0x7d   :  { %v267_v6 = vmul.f32 %v453_v62, %v253_v2  ;;  %v258_v7 = vmul.f32 %v447_v54, %v253_v2  ;;  %v260_v13 = vmul.f32 %v459_v1, %v253_v2  ;;  %v280_v8 = vmul.f32 %v472_v10, %v253_v2 }
  0x7e   :  { %v262_v9 = vmul.f32 %v476_v11, %v253_v2  ;;  %v294_v15 = vmul.f32 %v478_v12, %v253_v2 }
  0x7f   :  { %v268_v16 = vsub.f32 1.0, %v267_v6  ;;  %v270_v26 = vsub.f32 %v258_v7, %v265_v3  ;;  %v273_v17 = vadd.f32 %v264_v4, %v260_v13  ;;  %v276_v25 = vadd.f32 %v265_v3, %v258_v7 }
  0x80   :  { %v281_v18 = vsub.f32 1.0, %v280_v8  ;;  %v284_v28 = vsub.f32 %v262_v9, %v263_v5  ;;  %v287_v19 = vsub.f32 %v260_v13, %v264_v4  ;;  %v290_v62 = vadd.f32 %v263_v5, %v262_v9 }
  0x81   :  { %269 = vst [vmem:[#allocation5] sm:$0xff] %v268_v16  ;;  %272 = vst [vmem:[#allocation5 + $0x8] sm:$0xff] %v270_v26  ;;  %v295_v54 = vsub.f32 1.0, %v294_v15 }
  0x82   :  { %275 = vst [vmem:[#allocation5 + $0x10] sm:$0xff] %v273_v17  ;;  %278 = vst [vmem:[#allocation5 + $0x18] sm:$0xff] %v276_v25 }
  0x83   :  { %283 = vst [vmem:[#allocation5 + $0x20] sm:$0xff] %v281_v18  ;;  %286 = vst [vmem:[#allocation5 + $0x28] sm:$0xff] %v284_v28 }
  0x84   :  { %289 = vst [vmem:[#allocation5 + $0x30] sm:$0xff] %v287_v19  ;;  %292 = vst [vmem:[#allocation5 + $0x38] sm:$0xff] %v290_v62 }
  0x85   :  { %297 = vst [vmem:[#allocation5 + $0x40] sm:$0xff] %v295_v54 }
  0x86   :  { %378 = shalt.err (!%p375_p12)
}
  0x87   :  { %s379_s24 = scalar_lea.hbm %s514_s1, 1152 }
  0x88   :  { %p380_p13 = scmp.ne.s32.totalorder %s514_s1, %s379_s24  ;;  %p383_p0 = scmp.lt.u32.totalorder %s379_s24, %s514_s1 }
  0x8a   :  { %p385_p1 = pnand %p383_p0, %p380_p13 }
  0x8c   :  { %388 = shalt.err (!%p385_p1)
}
  0x8d   :  { %309 = dma.vmem_to_hbm [thread:$0]  %s304_s20, 1152, %s514_s1, [#allocation4], %s394_s16, %s394_s16, %s395_s17  }
  0x8e   :  { %391 = dma.done.wait [#allocation4], 1152  }
  0x8f   :  { %392 = vsyncadd [#allocation4], 4294966144 }
  0x90   :  { %313 = vsyncpa [#allocation3], 1 }
  0x91   :  { %314 = vsyncpa [#allocation4], 1 }

</bundles_post_ra>
